<compile_context>
chip_gen: v5e
topology: v5e:2x2
jax: 0.10.0
libtpu: 0.0.40
codegen_flags: <defaults>
</compile_context>

<pallas_src>
import functools

import jax
import jax.numpy as jnp
from jax.experimental import pallas as pl
from jax.experimental.pallas import tpu as pltpu


def _round_up(x, m):
    return ((x + m - 1) // m) * m


def _ensemble_matmul_kernel(x_ref, w_ref, b_ref, o_ref, acc_ref):
    """One (tm, tv) output tile; K (hidden) is the innermost reduction axis."""
    k = pl.program_id(2)
    nk = pl.num_programs(2)

    @pl.when(k == 0)
    def _():
        # Fold the pre-summed bias into the f32 accumulator exactly once per
        # output tile (not once per K step).
        acc_ref[...] = jnp.broadcast_to(
            b_ref[...].astype(jnp.float32), acc_ref.shape
        )

    # bf16 x bf16 -> f32 on the MXU, accumulated in the resident f32 scratch.
    acc_ref[...] += jnp.dot(
        x_ref[...], w_ref[...], preferred_element_type=jnp.float32
    )

    @pl.when(k == nk - 1)
    def _():
        # Single cast + store of the output tile at the end of the reduction.
        o_ref[...] = acc_ref[...].astype(o_ref.dtype)


def precompute_ensemble_params(weights, biases, compute_dtype=jnp.bfloat16):
    """One-time ensemble pre-reduction (hoist out of the per-call path).

    weights: (num_models, H, V)   biases: (num_models, V)
    returns: w_sum (H, V) in compute_dtype, b_sum (1, V) f32.
    """
    w_sum = weights.astype(jnp.float32).sum(axis=0).astype(compute_dtype)
    b_sum = biases.astype(jnp.float32).sum(axis=0).reshape(1, -1)
    return w_sum, b_sum


def basic_ensemble_forward_presummed(
    inputs,
    input_lengths,
    w_sum,
    b_sum,
    *,
    tm=1024,
    tv=1024,
    tk=1024,
    compute_dtype=jnp.bfloat16,
    out_dtype=None,
):
    """Ensemble forward given pre-summed parameters.

    inputs: (B, T, H)   w_sum: (H, V)   b_sum: (1, V)
    returns: (B, T, V) in out_dtype (defaults to inputs.dtype).
    """
    del input_lengths  # see TODO(synk) at top of file
    B, T, H = inputs.shape
    Hw, V = w_sum.shape
    assert Hw == H, f"hidden mismatch: inputs H={H}, w_sum H={Hw}"
    M = B * T
    out_dtype = inputs.dtype if out_dtype is None else out_dtype

    # --- Tile selection ------------------------------------------------------
    # Sublane (8) / lane (128) alignment; tiles shrink to cover small dims so
    # decode-sized M fits in a single M-tile (weights streamed from HBM once).
    tm = min(tm, _round_up(M, 8))
    tv = min(tv, _round_up(V, 128))
    tk = min(tk, _round_up(H, 128))

    # Pad each dimension up to a multiple of its tile (zero padding is exact
    # for an affine head: padded K contributes 0, padded M/V rows/cols are
    # sliced off below).  Keeps the output lane-dense (unmasked vst).
    M_pad = _round_up(M, tm)
    V_pad = _round_up(V, tv)
    H_pad = _round_up(H, tk)

    x2d = inputs.reshape(M, H)
    if (M_pad, H_pad) != (M, H):
        x2d = jnp.pad(x2d, ((0, M_pad - M), (0, H_pad - H)))
    x2d = x2d.astype(compute_dtype)

    w = w_sum
    if (H_pad, V_pad) != (H, V):
        w = jnp.pad(w, ((0, H_pad - H), (0, V_pad - V)))
    w = w.astype(compute_dtype)

    b = b_sum.astype(jnp.float32)
    if V_pad != V:
        b = jnp.pad(b, ((0, 0), (0, V_pad - V)))

    grid = (M_pad // tm, V_pad // tv, H_pad // tk)

    # --- VMEM budget (double-buffered inputs + f32 scratch + output tile) ----
    out_itemsize = jnp.dtype(out_dtype).itemsize
    in_itemsize = jnp.dtype(compute_dtype).itemsize
    vmem_needed = (
        2 * (tm * tk + tk * tv) * in_itemsize   # x, w tiles (double-buffered)
        + 2 * tv * 4                            # bias tile
        + 2 * tm * tv * out_itemsize            # output tile
        + tm * tv * 4                           # f32 accumulator scratch
    )
    vmem_limit = max(32 * 1024 * 1024, min(vmem_needed + (8 << 20), 64 * 1024 * 1024))

    out = pl.pallas_call(
        _ensemble_matmul_kernel,
        out_shape=jax.ShapeDtypeStruct((M_pad, V_pad), out_dtype),
        grid_spec=pltpu.PrefetchScalarGridSpec(
            num_scalar_prefetch=0,
            grid=grid,
            in_specs=[
                # activations tile
                pl.BlockSpec((tm, tk), lambda i, j, k: (i, k)),
                # pre-summed weight tile
                pl.BlockSpec((tk, tv), lambda i, j, k: (k, j)),
                # pre-summed bias tile (2-D, lane-aligned)
                pl.BlockSpec((1, tv), lambda i, j, k: (0, j)),
            ],
            # Same output block index across K -> tile stays resident; it is
            # written once at the last K step from the f32 scratch.
            out_specs=pl.BlockSpec((tm, tv), lambda i, j, k: (i, j)),
            scratch_shapes=[pltpu.VMEM((tm, tv), jnp.float32)],
        ),
        compiler_params=pltpu.CompilerParams(
            dimension_semantics=("parallel", "parallel", "arbitrary"),
            vmem_limit_bytes=int(vmem_limit),
        ),
    )(x2d, w, b)

    if (M_pad, V_pad) != (M, V):
        out = out[:M, :V]
    return out.reshape(B, T, V)


def basic_ensemble_forward(
    inputs, input_lengths, weights, biases, **kwargs
):
    """Convenience wrapper: per-call pre-sum + kernel.

    For repeated decode steps, call precompute_ensemble_params once and use
    basic_ensemble_forward_presummed directly (avoids re-reading all model
    weights from HBM every call).
    """
    compute_dtype = kwargs.get("compute_dtype", jnp.bfloat16)
    w_sum, b_sum = precompute_ensemble_params(weights, biases, compute_dtype)
    return basic_ensemble_forward_presummed(
        inputs, input_lengths, w_sum, b_sum, **kwargs
    )


def reference_forward(inputs, input_lengths, weights, biases):
    """f32 per-model loop, mirroring the PyTorch module's accumulation."""
    del input_lengths
    out = None
    for m in range(weights.shape[0]):
        h = jnp.dot(inputs, weights[m]) + biases[m]
        out = h if out is None else out + h
    return out


if __name__ == "__main__":
    key = jax.random.PRNGKey(0)
    k_x, k_w, k_b = jax.random.split(key, 3)

    B, T, H, V = 2, 8, 32, 128   # batch, seq, hidden, vocab (target characters)
    num_models = 3

    inputs = jax.random.normal(k_x, (B, T, H), dtype=jnp.float32)
    input_lengths = jnp.full((B,), T, dtype=jnp.int32)

    # Deterministic synthetic per-model parameters.
    weights = 0.02 * jax.random.normal(k_w, (num_models, H, V), dtype=jnp.float32)
    biases = 0.01 * jax.random.normal(k_b, (num_models, V), dtype=jnp.float32)

    # Hoisted one-time ensemble reduction (perf feedback), then the kernel.
    w_sum, b_sum = precompute_ensemble_params(weights, biases)
    fwd = functools.partial(basic_ensemble_forward_presummed)
    out = fwd(inputs, input_lengths, w_sum, b_sum)
    out = jax.block_until_ready(out)

    ref = reference_forward(inputs, input_lengths, weights, biases)
    assert out.shape == (B, T, V)
    # Tolerance loosened vs. pure-f32 because MXU inputs are bf16 (f32 accumulation).
    assert jnp.allclose(out, ref, atol=1e-2, rtol=1e-2), "mismatch vs reference"

    # Also exercise the convenience (per-call pre-sum) path once.
    out2 = jax.block_until_ready(
        basic_ensemble_forward(inputs, input_lengths, weights, biases)
    )
    assert jnp.allclose(out2, ref, atol=1e-2, rtol=1e-2), "mismatch vs reference (conv path)"

    print("KERNEL_OK")
</pallas_src>

<mosaic_0001>
module attributes {stable_mosaic.version = 11 : i64} {
  func.func @_ensemble_matmul_kernel(%arg0: i32, %arg1: i32, %arg2: i32, %arg3: memref<16x128xbf16, #tpu.memory_space<vmem>>, %arg4: memref<128x128xbf16, #tpu.memory_space<vmem>>, %arg5: memref<1x128xf32, #tpu.memory_space<vmem>>, %arg6: memref<16x128xf32, #tpu.memory_space<vmem>>, %arg7: memref<16x128xf32, #tpu.memory_space<vmem>>) attributes {dimension_semantics = [#tpu.dimension_semantics<parallel>, #tpu.dimension_semantics<parallel>, #tpu.dimension_semantics<arbitrary>], iteration_bounds = array<i64: 1, 1, 1>, scalar_prefetch = 0 : i64, scratch_operands = 1 : i64, tpu.core_type = #tpu.core_type<tc>, window_params = [{transform_indices = @transform_0, window_bounds = array<i64: 16, 128>}, {transform_indices = @transform_1, window_bounds = array<i64: 128, 128>}, {transform_indices = @transform_2, window_bounds = array<i64: 1, 128>}, {transform_indices = @transform_3, window_bounds = array<i64: 16, 128>}]} {
    %c0_i32 = arith.constant 0 : i32
    %0 = arith.cmpi eq, %arg2, %c0_i32 : i32
    %1 = arith.extui %0 : i1 to i32
    %c0_i32_0 = arith.constant 0 : i32
    %2 = arith.cmpi ne, %1, %c0_i32_0 : i32
    scf.if %2 {
      %c0_10 = arith.constant 0 : index
      %c0_11 = arith.constant 0 : index
      %12 = vector.load %arg5[%c0_10, %c0_11] : memref<1x128xf32, #tpu.memory_space<vmem>>, vector<1x128xf32>
      %13 = vector.shape_cast %12 : vector<1x128xf32> to vector<1x128xf32>
      %14 = vector.broadcast %13 : vector<1x128xf32> to vector<16x128xf32>
      %c0_12 = arith.constant 0 : index
      %c0_13 = arith.constant 0 : index
      %15 = vector.load %arg7[%c0_12, %c0_13] : memref<16x128xf32, #tpu.memory_space<vmem>>, vector<16x128xf32>
      tpu.vector_store %arg7[%c0_12, %c0_13], %14 {strides = array<i32>} : memref<16x128xf32, #tpu.memory_space<vmem>>, vector<16x128xf32>,
    } else {
    }
    %c0 = arith.constant 0 : index
    %c0_1 = arith.constant 0 : index
    %3 = vector.load %arg7[%c0, %c0_1] : memref<16x128xf32, #tpu.memory_space<vmem>>, vector<16x128xf32>
    %c0_2 = arith.constant 0 : index
    %c0_3 = arith.constant 0 : index
    %4 = vector.load %arg3[%c0_2, %c0_3] : memref<16x128xbf16, #tpu.memory_space<vmem>>, vector<16x128xbf16>
    %c0_4 = arith.constant 0 : index
    %c0_5 = arith.constant 0 : index
    %5 = vector.load %arg4[%c0_4, %c0_5] : memref<128x128xbf16, #tpu.memory_space<vmem>>, vector<128x128xbf16>
    %cst = arith.constant dense<0.000000e+00> : vector<16x128xf32>
    %6 = tpu.matmul %4, %5, %cst {dimension_numbers = #tpu.dot_dimension_numbers<[1], [0], [0], [1], [0, 0, 1, 1], [], []>} : vector<16x128xbf16>, vector<128x128xbf16>, vector<16x128xf32> -> vector<16x128xf32>
    %7 = arith.addf %3, %6 : vector<16x128xf32>
    %c0_6 = arith.constant 0 : index
    %c0_7 = arith.constant 0 : index
    %8 = vector.load %arg7[%c0_6, %c0_7] : memref<16x128xf32, #tpu.memory_space<vmem>>, vector<16x128xf32>
    tpu.vector_store %arg7[%c0_6, %c0_7], %7 {strides = array<i32>} : memref<16x128xf32, #tpu.memory_space<vmem>>, vector<16x128xf32>,
    %c0_i32_8 = arith.constant 0 : i32
    %9 = arith.cmpi eq, %arg2, %c0_i32_8 : i32
    %10 = arith.extui %9 : i1 to i32
    %c0_i32_9 = arith.constant 0 : i32
    %11 = arith.cmpi ne, %10, %c0_i32_9 : i32
    scf.if %11 {
      %c0_10 = arith.constant 0 : index
      %c0_11 = arith.constant 0 : index
      %12 = vector.load %arg7[%c0_10, %c0_11] : memref<16x128xf32, #tpu.memory_space<vmem>>, vector<16x128xf32>
      %c0_12 = arith.constant 0 : index
      %c0_13 = arith.constant 0 : index
      %13 = vector.load %arg6[%c0_12, %c0_13] : memref<16x128xf32, #tpu.memory_space<vmem>>, vector<16x128xf32>
      tpu.vector_store %arg6[%c0_12, %c0_13], %12 {strides = array<i32>} : memref<16x128xf32, #tpu.memory_space<vmem>>, vector<16x128xf32>,
    } else {
    }
    return
  }
  func.func @transform_0(%arg0: i32, %arg1: i32, %arg2: i32) -> (i32, i32) {
    %c0_i32 = arith.constant 0 : i32
    return %arg0, %arg2 : i32, i32
  }
  func.func @transform_1(%arg0: i32, %arg1: i32, %arg2: i32) -> (i32, i32) {
    %c0_i32 = arith.constant 0 : i32
    return %arg2, %arg1 : i32, i32
  }
  func.func @transform_2(%arg0: i32, %arg1: i32, %arg2: i32) -> (i32, i32) {
    %c0_i32 = arith.constant 0 : i32
    %c0_i32_0 = arith.constant 0 : i32
    return %c0_i32, %arg1 : i32, i32
  }
  func.func @transform_3(%arg0: i32, %arg1: i32, %arg2: i32) -> (i32, i32) {
    %c0_i32 = arith.constant 0 : i32
    return %arg0, %arg1 : i32, i32
  }
}

</mosaic_0001>

<bundles_post_ra>
// kernel: tpu_custom_call.1
= control target key start
LH: loop header
LB: loop body
LE: loop exit
PB: predicated region body
PF: predicated region fallthrough
CT: control target
= control target key end

     0   :  { %8 = vsyncpa [#allocation4], 0  ;;  %s346_s0 = inlined_call_operand.hbm [shape: bf16[16,128], index: 0, kind: input, shape index: {}]   ;;  %s347_s1 = inlined_call_operand.hbm [shape: bf16[128,128], index: 1, kind: input, shape index: {}]   ;;  %s348_s2 = inlined_call_operand.vmem [shape: f32[1,128], index: 2, kind: input, shape index: {}]   ;;  %s349_s3 = inlined_call_operand.hbm [shape: f32[16,128], index: 3, kind: output, shape index: {}]  }
   0x1   :  { %9 = vsyncpa [#allocation7], 0 }
   0x2   :  { %10 = vsyncpa [#allocation5], 0  ;;  %s15_s14 = sshll.u32 %s346_s0, 4  ;;  %s307_s15 = smov [#allocation3]   ;;  %s16_s14 = int_to_ptr.hbm [resolvable:$true] %s15_s14 }
   0x3   :  { %s17_s16 = sshll.u32 %s307_s15, 4  ;;  %s28_s19 = sshll.u32 %s347_s1, 4  ;;  %s18_s16 = int_to_ptr.vmem [resolvable:$true] %s17_s16  ;;  %s29_s19 = int_to_ptr.hbm [resolvable:$true] %s28_s19 }
   0x4   :  { %s308_s20 = smov 64   ;;  %s309_s21 = smov 4  }
   0x5   :  { %23 = dma.hbm_to_vmem [thread:$0]  %s16_s14, 128, %s18_s16, [#allocation4], %s308_s20, %s308_s20, %s309_s21  }
   0x6   :  { %s310_s22 = smov [#allocation6]  }
   0x7   :  { %s30_s23 = sshll.u32 %s310_s22, 4  ;;  %s31_s23 = int_to_ptr.vmem [resolvable:$true] %s30_s23 }
   0x8   :  { %36 = dma.hbm_to_vmem [thread:$0]  %s29_s19, 1024, %s31_s23, [#allocation7], %s308_s20, %s308_s20, %s309_s21  }
   0x9   :  { %301 = dma.done.wait [#allocation4], 128  }
   0xa   :  { %302 = vsyncadd [#allocation4], 4294967168 }
   0xb   :  { %303 = dma.done.wait [#allocation7], 1024  }
   0xc   :  { %304 = vsyncadd [#allocation7], 4294966272  ;;  %v220_v0 = vld [vmem:[#allocation6 + $0x38] sm:$0xff]  ;;  %v219_v1 = vld [vmem:[#allocation6 + $0x30] sm:$0xff]  ;;  %s311_s24 = smov [#allocation8]   ;;  %s162_s28 = sshll.u32 %s349_s3, 4  ;;  %s163_s28 = int_to_ptr.hbm [resolvable:$true] %s162_s28 }
   0xd   :  { %131 = vmatpush.bf16.msra.mxu0 %v220_v0  ;;  %v218_v2 = vld [vmem:[#allocation6 + $0x28] sm:$0xff]  ;;  %v217_v3 = vld [vmem:[#allocation6 + $0x20] sm:$0xff]  ;;  %v216_v4 = vld [vmem:[#allocation6 + $0x18] sm:$0xff]  ;;  %s160_s25 = sshll.u32 %s311_s24, 4  ;;  %s312_s29 = smov 128   ;;  %s161_s25 = int_to_ptr.vmem [resolvable:$true] %s160_s25 }
   0xe   :  { %v215_v5 = vld [vmem:[#allocation6 + $0x10] sm:$0xff]  ;;  %v214_v6 = vld [vmem:[#allocation6 + $0x8] sm:$0xff]  ;;  %v213_v7 = vld [vmem:[#allocation6] sm:$0xff]  ;;  %s313_s30 = smov 8  }
   0xf   :  { %v212_v8 = vld [vmem:[#allocation3] sm:$0xff] }
  0x10   :  { %v228_v9 = vld [vmem:[%s348_s2] ss:$0 sm:$0xff] }
  0x11   :  { %132 = vmatpush.bf16.msra.mxu0 %v219_v1 }
  0x15   :  { %133 = vmatpush.bf16.msra.mxu0 %v218_v2 }
  0x19   :  { %134 = vmatpush.bf16.msra.mxu0 %v217_v3 }
  0x1d   :  { %135 = vmatpush.bf16.msra.mxu0 %v216_v4 }
  0x21   :  { %136 = vmatpush.bf16.msra.mxu0 %v215_v5 }
  0x25   :  { %137 = vmatpush.bf16.msra.mxu0 %v214_v6 }
  0x29   :  { %138 = vmatpush.bf16.msra.mxu0 %v213_v7 }
  0x2c   :  { %139 = vmatmul.bf16.vlgmr.msra.gmra.mxu0 %v212_v8 }
  0xa9   :  { %v140_v10 = vpop.f32.mrf.mxu0 }
  0xaa   :  { %v145_v11 = vadd.f32 %v228_v9, %v140_v10 }
  0xac   :  { %154 = vst [vmem:[#allocation8] sm:$0xff] %v145_v11 }
  0xb1   :  { %v142_v12 = vpop.f32.mrf.mxu0 }
  0xb2   :  { %v146_v13 = vadd.f32 %v228_v9, %v142_v12 }
  0xb4   :  { %155 = vst [vmem:[#allocation8 + $0x8] sm:$0xff] %v146_v13 }
  0xb5   :  { %168 = dma.vmem_to_hbm [thread:$0]  %s161_s25, 256, %s163_s28, [#allocation5], %s312_s29, %s312_s29, %s313_s30  }
  0xb6   :  { %305 = dma.done.wait [#allocation5], 256  }
  0xb7   :  { %306 = vsyncadd [#allocation5], 4294967040 }
  0xb8   :  { %173 = vsyncpa [#allocation4], 1 }
  0xb9   :  { %174 = vsyncpa [#allocation7], 1 }
  0xba   :  { %175 = vsyncpa [#allocation5], 1 }

</bundles_post_ra>
